<compile_context>
chip_gen: v7x
topology: tpu7x:2x2x1
jax: 0.10.0
libtpu: 0.0.40
codegen_flags: <defaults>
</compile_context>

<pallas_src>
import functools

import jax
import jax.numpy as jnp
from jax.experimental import pallas as pl
from jax.experimental.pallas import tpu as pltpu

LANE = 128
SUBLANE = 8
ROW_TILE_MAX = 8192  # (8192, 128) f32 = 4 MiB per input block


def _masked_sq_sum_kernel(p_ref, t_ref, m_ref, o_ref, *, rows_valid, row_tile,
                          needs_mask):
    """Accumulate sum((p - t)^2 * m) for this slice into a (1, 8, 128) f32 block."""
    c = pl.program_id(0)  # TensorCore slice (parallel)
    i = pl.program_id(1)  # row-tile within the slice (arbitrary / reduction)

    @pl.when(i == 0)
    def _():
        o_ref[...] = jnp.zeros_like(o_ref)

    # Cast to f32 inside the kernel; inputs stream in their native (narrow) dtypes.
    p = p_ref[...].astype(jnp.float32)
    t = t_ref[...].astype(jnp.float32)
    m = m_ref[...].astype(jnp.float32)
    d = p - t
    contrib = d * d * m  # (row_tile, LANE) f32

    def fold_into_acc(x):
        # Fold groups of 8 rows into one (8, 128) vreg: pure VPU adds.
        folded = jnp.sum(x.reshape(row_tile // SUBLANE, SUBLANE, LANE), axis=0)
        o_ref[...] += folded[None, :, :]

    if needs_mask:
        # Only tiles that extend past the valid rows pay the iota/cmp/select.
        gt = c * pl.num_programs(1) + i        # logical global tile index
        row0 = gt * row_tile
        tile_overhangs = row0 + row_tile > rows_valid

        @pl.when(tile_overhangs)
        def _():
            row_ids = row0 + jax.lax.broadcasted_iota(
                jnp.int32, (row_tile, LANE), 0)
            # where BEFORE any reduction: garbage (NaN/Inf) rows are selected away.
            fold_into_acc(jnp.where(row_ids < rows_valid, contrib, 0.0))

        @pl.when(jnp.logical_not(tile_overhangs))
        def _():
            fold_into_acc(contrib)
    else:
        fold_into_acc(contrib)


def masked_mse_loss(prediction, target, mask):
    """Masked MSE loss: mean((prediction - target)**2 * mask) over all elements."""
    assert prediction.shape == target.shape == mask.shape
    n_elems = prediction.size

    # Keep the mask narrow: bool -> int8 (byte-for-byte); never widen to f32 here.
    if mask.dtype == jnp.bool_:
        mask = mask.astype(jnp.int8)

    p_flat = prediction.reshape(-1)
    t_flat = target.reshape(-1)
    m_flat = mask.reshape(-1)

    # Main slab: largest prefix that is a whole number of (8, 128) vregs.
    n_main = (n_elems // (SUBLANE * LANE)) * (SUBLANE * LANE)
    total = jnp.float32(0.0)

    if n_main > 0:
        rows = n_main // LANE  # guaranteed multiple of SUBLANE

        # Even tile count (>= 2) so both v7x TensorCores always get work; tile size
        # derived from it, up to ROW_TILE_MAX rows (~4 MiB f32 blocks).
        num_tiles = max(2, 2 * pl.cdiv(pl.cdiv(rows, ROW_TILE_MAX), 2))
        row_tile = pl.cdiv(pl.cdiv(rows, num_tiles), SUBLANE) * SUBLANE
        num_slices = 2
        tiles_per_slice = num_tiles // num_slices
        needs_mask = (num_tiles * row_tile != rows)

        # Clamp logical tile -> last in-bounds block so overhanging tiles never
        # issue an out-of-range DMA; their contribution is zeroed in-kernel.
        max_block = pl.cdiv(rows, row_tile) - 1

        def idx_map(c, i):
            return (jnp.minimum(c * tiles_per_slice + i, max_block), 0)

        in_spec = pl.BlockSpec((row_tile, LANE), idx_map)

        def slab(x):
            # No pad, no dtype cast: contiguous bytes reinterpreted as (rows, 128).
            return x[:n_main].reshape(rows, LANE)

        kernel = functools.partial(
            _masked_sq_sum_kernel,
            rows_valid=rows,
            row_tile=row_tile,
            needs_mask=needs_mask,
        )

        partials = pl.pallas_call(
            kernel,
            out_shape=jax.ShapeDtypeStruct((num_slices, SUBLANE, LANE), jnp.float32),
            grid_spec=pltpu.PrefetchScalarGridSpec(
                num_scalar_prefetch=0,
                grid=(num_slices, tiles_per_slice),
                in_specs=[in_spec, in_spec, in_spec],
                out_specs=pl.BlockSpec((1, SUBLANE, LANE), lambda c, i: (c, 0, 0)),
            ),
            compiler_params=pltpu.CompilerParams(
                dimension_semantics=("parallel", "arbitrary"),
                vmem_limit_bytes=32 * 1024 * 1024,
            ),
        )(slab(p_flat), slab(t_flat), slab(m_flat))

        total = total + jnp.sum(partials)

    n_tail = n_elems - n_main
    if n_tail > 0:
        # Tiny ragged tail (< 1024 elems) handled in plain JAX glue.
        dp = p_flat[n_main:].astype(jnp.float32) - t_flat[n_main:].astype(jnp.float32)
        total = total + jnp.sum(dp * dp * m_flat[n_main:].astype(jnp.float32))

    # Denominator is the ORIGINAL element count (torch reduction='mean').
    return total / jnp.float32(n_elems)


if __name__ == "__main__":
    key = jax.random.PRNGKey(0)
    k1, k2, k3 = jax.random.split(key, 3)

    # NCHW-shaped synthetic inputs (batch=2, channels=4, spatial=16x16).
    shape = (2, 4, 16, 16)
    prediction = jax.random.normal(k1, shape, dtype=jnp.float32)
    target = jax.random.normal(k2, shape, dtype=jnp.float32)
    # Mask kept narrow (bool) at the call site; widened to f32 only inside the kernel.
    mask = jax.random.uniform(k3, shape) > 0.5

    loss = masked_mse_loss(prediction, target, mask)
    loss = jax.block_until_ready(loss)

    # Reference check (torch semantics: mse_loss(reduction='none') * mask -> mean()).
    ref = jnp.mean((prediction - target) ** 2 * mask.astype(jnp.float32))
    assert jnp.allclose(loss, ref, rtol=1e-5, atol=1e-6), (loss, ref)

    print("KERNEL_OK")
</pallas_src>

<mosaic_0001>
module attributes {stable_mosaic.version = 11 : i64} {
  func.func @_masked_sq_sum_kernel(%arg0: i32, %arg1: i32, %arg2: memref<8x128xf32, #tpu.memory_space<vmem>>, %arg3: memref<8x128xf32, #tpu.memory_space<vmem>>, %arg4: memref<8x128xi8, #tpu.memory_space<vmem>>, %arg5: memref<1x8x128xf32, #tpu.memory_space<vmem>>) attributes {dimension_semantics = [#tpu.dimension_semantics<parallel>, #tpu.dimension_semantics<arbitrary>], iteration_bounds = array<i64: 2, 1>, scalar_prefetch = 0 : i64, scratch_operands = 0 : i64, tpu.core_type = #tpu.core_type<tc>, window_params = [{transform_indices = @transform_0, window_bounds = array<i64: 8, 128>}, {transform_indices = @transform_1, window_bounds = array<i64: 8, 128>}, {transform_indices = @transform_2, window_bounds = array<i64: 8, 128>}, {transform_indices = @transform_3, window_bounds = array<i64: 1, 8, 128>}]} {
    %c0_i32 = arith.constant 0 : i32
    %0 = arith.cmpi eq, %arg1, %c0_i32 : i32
    %1 = arith.extui %0 : i1 to i32
    %c0_i32_0 = arith.constant 0 : i32
    %2 = arith.cmpi ne, %1, %c0_i32_0 : i32
    scf.if %2 {
      %cst_12 = arith.constant 0.000000e+00 : f32
      %16 = vector.broadcast %cst_12 : f32 to vector<1x8x128xf32>
      %c0_13 = arith.constant 0 : index
      %c0_14 = arith.constant 0 : index
      %c0_15 = arith.constant 0 : index
      %17 = vector.load %arg5[%c0_13, %c0_14, %c0_15] : memref<1x8x128xf32, #tpu.memory_space<vmem>>, vector<1x8x128xf32>
      tpu.vector_store %arg5[%c0_13, %c0_14, %c0_15], %16 {strides = array<i32>} : memref<1x8x128xf32, #tpu.memory_space<vmem>>, vector<1x8x128xf32>,
    } else {
    }
    %c0 = arith.constant 0 : index
    %c0_1 = arith.constant 0 : index
    %3 = vector.load %arg2[%c0, %c0_1] : memref<8x128xf32, #tpu.memory_space<vmem>>, vector<8x128xf32>
    %c0_2 = arith.constant 0 : index
    %c0_3 = arith.constant 0 : index
    %4 = vector.load %arg3[%c0_2, %c0_3] : memref<8x128xf32, #tpu.memory_space<vmem>>, vector<8x128xf32>
    %c0_4 = arith.constant 0 : index
    %c0_5 = arith.constant 0 : index
    %5 = vector.load %arg4[%c0_4, %c0_5] : memref<8x128xi8, #tpu.memory_space<vmem>>, vector<8x128xi8>
    %6 = arith.sitofp %5 : vector<8x128xi8> to vector<8x128xf32>
    %7 = arith.subf %3, %4 : vector<8x128xf32>
    %8 = arith.mulf %7, %7 : vector<8x128xf32>
    %9 = arith.mulf %8, %6 : vector<8x128xf32>
    %10 = vector.shape_cast %9 : vector<8x128xf32> to vector<1x8x128xf32>
    %cst = arith.constant dense<0.000000e+00> : vector<8x128xf32>
    %11 = vector.multi_reduction <add>, %10, %cst [0] : vector<1x8x128xf32> to vector<8x128xf32>
    %c0_6 = arith.constant 0 : index
    %c0_7 = arith.constant 0 : index
    %c0_8 = arith.constant 0 : index
    %12 = vector.load %arg5[%c0_6, %c0_7, %c0_8] : memref<1x8x128xf32, #tpu.memory_space<vmem>>, vector<1x8x128xf32>
    %13 = vector.shape_cast %11 : vector<8x128xf32> to vector<1x8x128xf32>
    %14 = arith.addf %12, %13 : vector<1x8x128xf32>
    %c0_9 = arith.constant 0 : index
    %c0_10 = arith.constant 0 : index
    %c0_11 = arith.constant 0 : index
    %15 = vector.load %arg5[%c0_9, %c0_10, %c0_11] : memref<1x8x128xf32, #tpu.memory_space<vmem>>, vector<1x8x128xf32>
    tpu.vector_store %arg5[%c0_9, %c0_10, %c0_11], %14 {strides = array<i32>} : memref<1x8x128xf32, #tpu.memory_space<vmem>>, vector<1x8x128xf32>,
    return
  }
  func.func @transform_0(%arg0: i32, %arg1: i32) -> (i32, i32) {
    %c1_i32 = arith.constant 1 : i32
    %0 = arith.muli %arg0, %c1_i32 : i32
    %1 = arith.addi %0, %arg1 : i32
    %c1_i32_0 = arith.constant 1 : i32
    %2 = arith.minsi %1, %c1_i32_0 : i32
    %c0_i32 = arith.constant 0 : i32
    %c0_i32_1 = arith.constant 0 : i32
    return %2, %c0_i32 : i32, i32
  }
  func.func @transform_1(%arg0: i32, %arg1: i32) -> (i32, i32) {
    %c1_i32 = arith.constant 1 : i32
    %0 = arith.muli %arg0, %c1_i32 : i32
    %1 = arith.addi %0, %arg1 : i32
    %c1_i32_0 = arith.constant 1 : i32
    %2 = arith.minsi %1, %c1_i32_0 : i32
    %c0_i32 = arith.constant 0 : i32
    %c0_i32_1 = arith.constant 0 : i32
    return %2, %c0_i32 : i32, i32
  }
  func.func @transform_2(%arg0: i32, %arg1: i32) -> (i32, i32) {
    %c1_i32 = arith.constant 1 : i32
    %0 = arith.muli %arg0, %c1_i32 : i32
    %1 = arith.addi %0, %arg1 : i32
    %c1_i32_0 = arith.constant 1 : i32
    %2 = arith.minsi %1, %c1_i32_0 : i32
    %c0_i32 = arith.constant 0 : i32
    %c0_i32_1 = arith.constant 0 : i32
    return %2, %c0_i32 : i32, i32
  }
  func.func @transform_3(%arg0: i32, %arg1: i32) -> (i32, i32, i32) {
    %c0_i32 = arith.constant 0 : i32
    %c0_i32_0 = arith.constant 0 : i32
    %c0_i32_1 = arith.constant 0 : i32
    return %arg0, %c0_i32, %c0_i32_0 : i32, i32, i32
  }
}

</mosaic_0001>

<bundles_post_ra>
// kernel: tpu_custom_call.1
= control target key start
LH: loop header
LB: loop body
LE: loop exit
PB: predicated region body
PF: predicated region fallthrough
CT: control target
= control target key end

     0   :  { %s1004_s0 = inlined_call_operand.hbm [shape: f32[16,128], index: 0, kind: input, shape index: {}]   ;;  %s1005_s1 = inlined_call_operand.hbm [shape: f32[16,128], index: 1, kind: input, shape index: {}]   ;;  %s1006_s2 = inlined_call_operand.vmem [shape: s8[16,128], index: 2, kind: input, shape index: {}]   ;;  %s1007_s3 = inlined_call_operand.hbm [shape: f32[2,8,128], index: 3, kind: output, shape index: {}]  }
   0x1   :  { %1012 = sst [smem:[#allocation11_spill]] %s1004_s0 }
   0x2   :  { %8 = vsyncpa [#allocation3], 0 }
   0x3   :  { %10 = vsyncpa [#allocation3 + $0x1], 0 }
   0x4   :  { %11 = vsyncpa [#allocation6], 0 }
   0x5   :  { %13 = vsyncpa [#allocation6 + $0x1], 0 }
   0x6   :  { %14 = vsyncpa [#allocation4], 0 }
   0x7   :  { %16 = vsyncpa [#allocation4 + $0x1], 0  ;;  %s748_s12 = smov 0   ;;  %s750_s13 = smov 0  }
   0x8   :  { %s752_s14 = smov 0   ;;  %s754_s15 = smov 0  }
   0x9   :  { %s756_s16 = smov 0   ;;  %s758_s17 = smov 0  }
   0xa   :  { %s760_s18 = smov 0   ;;  %s762_s19 = smov 0  }
   0xb   :  { %s764_s20 = smov 0  }
   0xc LB: > { %s441_s21 = sadd.s32 4294967295, %s723_s20   ;;  %s442_s22 = sadd.s32 4294967294, %s723_s20   ;;  %s723_s20 = sphi %s764_s20, %s22_s20   ;;  %s719_s19 = sphi %s762_s19, %s1036_s19   ;;  %s715_s18 = sphi %s760_s18, %s1035_s18   ;;  %s711_s17 = sphi %s758_s17, %s1034_s17   ;;  %s707_s16 = sphi %s756_s16, %s1033_s16   ;;  %s703_s15 = sphi %s754_s15, %s1032_s15   ;;  %s699_s14 = sphi %s752_s14, %s1031_s14   ;;  %s695_s13 = sphi %s750_s13, %s1030_s13   ;;  %s691_s12 = sphi %s748_s12, %s1029_s12  }
   0xd   : > { %s34_s23 = sadd.s32 1, %s719_s19  ;;  %p39_p0 = scmp.lt.s32.totalorder %s719_s19, 1 }
   0xe   : > { %p36_p1 = scmp.ge.s32.totalorder %s34_s23, 2  ;;  %s47_s24 = sadd.s32 1, %s711_s17 }
   0xf   : > { %s797_s25 = scalar_select %p39_p0, %s719_s19, 1 }
  0x10   : > { %s1038_s23 = smov (%p36_p1, %s34_s23), 0  ;;  %p54_p2 = scmp.ne.s32.totalorder %s711_s17, %s707_s16 }
  0x11   : > { %p55_p3 = scmp.eq.s32.totalorder %s723_s20, 0  ;;  %p42_p4 = scmp.lt.s32.totalorder %s1038_s23, 1 }
  0x12   : > { %p60_p5 = scmp.ne.s32.totalorder %s707_s16, %s703_s15  ;;  %p61_p7 = scmp.eq.s32.totalorder %s441_s21, 0 }
  0x13   : > { %p806_p6 = por %p55_p3, %p54_p2  ;;  %s134_s29 = ssub.s32 %s719_s19, %s1038_s23 }
  0x14   : > { %s43_s27 = scalar_select %p42_p4, %s1038_s23, 1 }
  0x15   : > { %p811_p8 = por %p61_p7, %p60_p5  ;;  %p135_p9 = scmp.eq.s32.totalorder %s134_s29, 0 }
  0x16   : > { %s44_s30 = ssub.s32 %s797_s25, %s43_s27  ;;  %s137_s4 = sadd.s32 1, %s699_s14 }
  0x17   : > { %s1014_s28 = scalar_select %p811_p8, 1, 0 }
  0x18   : > { %p45_p10 = scmp.eq.s32.totalorder %s44_s30, 0  ;;  %p147_p11 = scmp.ne.s32.totalorder %s699_s14, %s695_s13 }
  0x19   : > { %s820_s5 = scalar_select %p135_p9, %s699_s14, %s137_s4  }
  0x1a   : > { %s823_s6 = scalar_select %p45_p10, %s711_s17, %s47_s24  }
  0x1b   : > { %p148_p12 = scmp.eq.s32.totalorder %s441_s21, 1  ;;  %p153_p13 = scmp.ne.s32.totalorder %s695_s13, %s691_s12 }
  0x1c   : > { %p154_p0 = scmp.eq.s32.totalorder %s442_s22, 1  ;;  %p478_p4 = scmp.lt.s32.totalorder %s723_s20, 2 }
  0x1d   : > { %p829_p1 = por %p148_p12, %p147_p11  ;;  %s840_s9 = sand.u32 1, %s711_s17  }
  0x1e   : > { %p834_p3 = por %p154_p0, %p153_p13  ;;  %s1009_s10 = sshll.u32 %s797_s25, 7 }
  0x1f   : > { %s1015_s7 = scalar_select %p829_p1, 1, 0 }
  0x20   : > { %s1016_s8 = scalar_select %p834_p3, 1, 0 }
  0x21   : > { %s1008_s11 = sshll.u32 %s840_s9, 3  ;;  %s1017_s0 = sld [smem:[#allocation11_spill]] }
  0x22   : > { %s178_s24 = scalar_lea.vmem [#allocation2], %s1008_s11  ;;  %p855_p5 = pnand %p478_p4, %p806_p6 }
  0x23   : > { %s188_s27 = sshll.u32 %s178_s24, 4  ;;  %s175_s30 = scalar_lea.sflag [#allocation3], %s840_s9  ;;  %s859_s27 = int_to_ptr.vmem [resolvable:$true] %s188_s27 }
  0x24   : > { %p555_p11 = pneg %p855_p5 }
  0x27   : > { %s849_s22 = scalar_lea.hbm %s1017_s0, %s1009_s10  ;;  %s558_s21 = scalar_lea.hbm %s1017_s0, 256 }
  0x28   : > { %s553_s4 = scalar_lea.hbm %s849_s22, 128  ;;  %p559_p6 = scmp.lt.u32.totalorder %s849_s22, %s1017_s0 }
  0x29   : > { %p554_p10 = scmp.ne.s32.totalorder %s849_s22, %s553_s4  ;;  %p560_p0 = scmp.lt.u32.totalorder %s558_s21, %s553_s4 }
  0x2a   : > { %p562_p2 = scmp.lt.u32.totalorder %s553_s4, %s849_s22 }
  0x2b   : > { %p556_p12 = pnand %p555_p11, %p554_p10  ;;  %p561_p4 = por %p560_p0, %p559_p6 }
  0x2d   : > { %p557_p13 = pneg %p556_p12  ;;  %p563_p7 = por %p562_p2, %p561_p4 }
  0x2f   : > { %p564_p9 = pnand %p563_p7, %p557_p13 }
  0x31   : > { %567 = shalt.err (!%p564_p9)
}
  0x32   : > { %s568_s10 = scalar_lea.vmem %s859_s27, 128  ;;  %s725_s26 = smov [#allocation2]  }
  0x33   : > { %p569_p10 = scmp.ne.s32.totalorder %s859_s27, %s568_s10  ;;  %s573_s15 = sshll.u32 %s725_s26, 4  ;;  %s574_s15 = int_to_ptr.vmem [resolvable:$false] %s573_s15 }
  0x34   : > { %s575_s11 = scalar_lea.vmem %s574_s15, 256  ;;  %p576_p1 = scmp.lt.s32.totalorder %s859_s27, %s574_s15 }
  0x35   : > { %p571_p12 = pnand %p569_p10, %p555_p11  ;;  %p577_p6 = scmp.lt.s32.totalorder %s575_s11, %s568_s10 }
  0x37   : > { %p572_p3 = pneg %p571_p12  ;;  %p578_p0 = por %p577_p6, %p576_p1 }
  0x39   : > { %p579_p2 = pnand %p578_p0, %p572_p3 }
  0x3b   : > { %582 = shalt.err (!%p579_p2)
}
  0x3c   : > { %470 = dma.hbm_to_vmem [thread:$0]  (!%p855_p5), %s849_s22, 128, %s859_s27, %s175_s30  }
  0x3d   : > { %p1019_p7 = scmp.lt.s32.totalorder %s723_s20, 3  ;;  %p1020_p9 = scmp.ge.s32.totalorder %s723_s20, 1 }
  0x3e   : > { %s1022_s10 = sshll.u32 %s797_s25, 7  ;;  %s1023_s15 = sshll.u32 %s840_s9, 3 }
  0x3f   : > { %p893_p13 = pnand %p1020_p9, %p1019_p7  ;;  %s902_s26 = scalar_lea.hbm %s1005_s1, %s1022_s10 }
  0x40   : > { %s199_s11 = scalar_lea.vmem [#allocation5], %s1023_s15  ;;  %s196_s22 = scalar_lea.sflag [#allocation6], %s840_s9 }
  0x41   : > { %s1021_s4 = scalar_select %p893_p13, 1, 0 }
  0x42   : > { %s209_s0 = sshll.u32 %s199_s11, 4  ;;  %s583_s27 = scalar_lea.hbm %s902_s26, 128  ;;  %s210_s0 = int_to_ptr.vmem [resolvable:$true] %s209_s0 }
  0x43   : > { %p584_p1 = scmp.ne.s32.totalorder %s902_s26, %s583_s27  ;;  %s588_s10 = scalar_lea.hbm %s1005_s1, 256 }
  0x44   : > { %p589_p10 = scmp.lt.u32.totalorder %s902_s26, %s1005_s1  ;;  %p590_p12 = scmp.lt.u32.totalorder %s588_s10, %s583_s27 }
  0x45   : > { %p586_p3 = pnand %p584_p1, %p555_p11  ;;  %p592_p0 = scmp.lt.u32.totalorder %s583_s27, %s902_s26 }
  0x46   : > { %p591_p6 = por %p590_p12, %p589_p10 }
  0x47   : > { %p587_p4 = pneg %p586_p3 }
  0x48   : > { %p593_p2 = por %p592_p0, %p591_p6 }
  0x4a   : > { %p594_p7 = pnand %p593_p2, %p587_p4 }
  0x4c   : > { %597 = shalt.err (!%p594_p7)
}
  0x4d   : > { %s598_s9 = scalar_lea.vmem %s210_s0, 128  ;;  %s726_s15 = smov [#allocation5]  }
  0x4e   : > { %p599_p9 = scmp.ne.s32.totalorder %s210_s0, %s598_s9  ;;  %s603_s11 = sshll.u32 %s726_s15, 4  ;;  %s604_s11 = int_to_ptr.vmem [resolvable:$false] %s603_s11 }
  0x4f   : > { %s605_s25 = scalar_lea.vmem %s604_s11, 256  ;;  %p606_p8 = scmp.lt.s32.totalorder %s210_s0, %s604_s11 }
  0x50   : > { %p601_p1 = pnand %p599_p9, %p555_p11  ;;  %p607_p13 = scmp.lt.s32.totalorder %s605_s25, %s598_s9 }
  0x52   : > { %p602_p3 = pneg %p601_p1  ;;  %p608_p10 = por %p607_p13, %p606_p8 }
  0x54   : > { %p609_p12 = pnand %p608_p10, %p602_p3 }
  0x56   : > { %612 = shalt.err (!%p609_p12)
}
  0x57   : > { %473 = dma.hbm_to_vmem [thread:$0]  (!%p855_p5), %s902_s26, 128, %s210_s0, %s196_s22  }
  0x58   : > { %p1024_p4 = scmp.ne.s32.totalorder %s1021_s4, 0 }
  0x59   : > { %s233_s27 = sand.u32 (!%p1024_p4), 1, %s707_s16   ;;  %p1025_p11 = scmp.ne.s32.totalorder (!%p1024_p4), %s1014_s28, 0 }
  0x5a   : > { %231 = sbr.rel (%p1024_p4) target bundleno = 130 (0x82), region = 32  ;;  %s450_s30 = sshll.u32 (!%p1024_p4), %s233_s27, 3 }
  0x5b   : > { %s234_s10 = scalar_lea.sflag (!%p1024_p4), [#allocation3], %s233_s27  ;;  %s237_s21 = scalar_lea.vmem (!%p1024_p4), [#allocation2], %s450_s30 }
  0x61   : > { %678 = dma.done.wait (%p1025_p11), %s234_s10, 128  }
  0x62   : > { %680 = vsyncadd (%p1025_p11), %s234_s10, 4294967168  ;;  %s243_s24 = scalar_lea.sflag [#allocation6], %s233_s27  ;;  %s246_s9 = scalar_lea.vmem [#allocation5], %s450_s30 }
  0x63   : > { %682 = dma.done.wait (%p1025_p11), %s243_s24, 128  }
  0x64   : > { %684 = vsyncadd (%p1025_p11), %s243_s24, 4294967168  ;;  %p288_p8 = scmp.lt.s32.totalorder %s715_s18, 1  ;;  %s278_s29 = sand.u32 1, %s695_s13   ;;  %v302_v0 = vld [vmem:[%s237_s21] sm:$0xff]  ;;  %v303_v1 = vld [vmem:[%s246_s9] sm:$0xff] }
  0x65   : > { %s452_s4 = sshll.u32 %s278_s29, 3  ;;  %v307_v2 = vsub.f32 %v302_v0, %v303_v1  ;;  %s458_s28 = sshll.u32 %s715_s18, 7 }
  0x66   : > { %s289_s0 = scalar_select %p288_p8, %s715_s18, 1 }
  0x67   : > { %v308_v5 = vmul.f32 %v307_v2, %v307_v2  ;;  %s280_s25 = scalar_lea.vmem [#allocation7], %s452_s4  ;;  %s947_s24 = scalar_lea.hbm %s1007_s3, %s458_s28 }
  0x68   : > { %s1040_s0 = smov (!%p288_p8, %s289_s0), 1  ;;  %s328_s27 = sshll.u32 %s280_s25, 4  ;;  %s949_s27 = int_to_ptr.vmem [resolvable:$true] %s328_s27 }
  0x69   : > { %s456_s26 = sshll.u32 %s1040_s0, 1  ;;  %s315_s21 = scalar_lea.sflag [#allocation4], %s278_s29 }
  0x6a   : > { %s293_s11 = scalar_lea.vmem %s1006_s2, %s456_s26  ;;  %s613_s9 = scalar_lea.vmem %s949_s27, 128 }
  0x6b   : > { %v304_v3 = vld [vmem:[%s293_s11] sm:$0x3]  ;;  %p614_p5 = scmp.ne.s32.totalorder %s949_s27, %s613_s9  ;;  %p1026_p13 = scmp.ne.s32.totalorder %s1015_s7, 0 }
  0x6c   : > { %v305_v4 = vunpack.c.0.s8 %v304_v3  ;;  %s727_s18 = smov [#allocation7]  }
  0x6d   : > { %p615_p6 = pnand %p614_p5, %p1026_p13  ;;  %s617_s0 = sshll.u32 %s727_s18, 4  ;;  %s618_s0 = int_to_ptr.vmem [resolvable:$false] %s617_s0 }
  0x6e   : > { %v306_v6 = vcvt.s32.f32 %v305_v4  ;;  %s619_s4 = scalar_lea.vmem %s618_s0, 256  ;;  %p620_p2 = scmp.lt.s32.totalorder %s949_s27, %s618_s0 }
  0x6f   : > { %p616_p0 = pneg %p615_p6  ;;  %p621_p7 = scmp.lt.s32.totalorder %s619_s4, %s613_s9 }
  0x70   : > { %v309_v7 = vmul.f32 %v308_v5, %v306_v6 }
  0x71   : > { %p622_p9 = por %p621_p7, %p620_p2 }
  0x72   : > { %313 = vst [vmem:[%s280_s25] sm:$0xff] %v309_v7 }
  0x73   : > { %p623_p1 = pnand %p622_p9, %p616_p0 }
  0x75   : > { %626 = shalt.err (!%p623_p1)
}
  0x76   : > { %s627_s29 = scalar_lea.hbm %s947_s24, 128  ;;  %s631_s15 = scalar_lea.hbm %s1007_s3, 256 }
  0x77   : > { %p628_p3 = scmp.ne.s32.totalorder %s947_s24, %s627_s29  ;;  %p632_p4 = scmp.lt.u32.totalorder %s947_s24, %s1007_s3 }
  0x78   : > { %p633_p11 = scmp.lt.u32.totalorder %s631_s15, %s627_s29  ;;  %p635_p5 = scmp.lt.u32.totalorder %s627_s29, %s947_s24 }
  0x79   : > { %p629_p10 = pnand %p628_p3, %p1026_p13 }
  0x7a   : > { %p634_p8 = por %p633_p11, %p632_p4 }
  0x7b   : > { %p630_p12 = pneg %p629_p10 }
  0x7c   : > { %p636_p6 = por %p635_p5, %p634_p8 }
  0x7e   : > { %p637_p0 = pnand %p636_p6, %p630_p12 }
  0x80   : > { %640 = shalt.err (!%p637_p0)
}
  0x81   : > { %465 = dma.vmem_to_hbm [thread:$0]  (%p1026_p13), %s949_s27, 128, %s947_s24, %s315_s21  }
  0x82 PF: > { %s340_s25 = sand.u32 1, %s691_s12   ;;  %p1027_p2 = scmp.ne.s32.totalorder %s1016_s8, 0 }
  0x83   : > { %p1028_p7 = scmp.ge.s32.totalorder %s723_s20, 2  ;;  %s341_s30 = scalar_lea.sflag [#allocation4], %s340_s25 }
  0x85   : > { %p475_p9 = pnand %p1028_p7, %p1027_p2 }
  0x87   : > { %686 = dma.done.wait (!%p475_p9), %s341_s30, 128  }
  0x88   : > { %688 = vsyncadd (!%p475_p9), %s341_s30, 4294967168  ;;  %s22_s20 = sadd.s32 1, %s723_s20   ;;  %s1029_s12 = smov %s695_s13 }
  0x89   : > { %p19_p1 = scmp.ge.s32.totalorder %s22_s20, 4   ;;  %s1030_s13 = smov %s699_s14 }
  0x8a   : > { %s1031_s14 = smov %s820_s5  ;;  %s1032_s15 = smov %s707_s16 }
  0x8b   : > { %s1033_s16 = smov %s711_s17  ;;  %s1034_s17 = smov %s823_s6 }
  0x8c   : > { %s1035_s18 = smov %s719_s19  ;;  %s1036_s19 = smov %s1038_s23 }
  0x8d   :  { %21 = sbr.rel (!%p19_p1) target bundleno = 12 (0xc), region = 97 }
  0x94   :  { %346 = vsyncpa [#allocation3], 1 }
  0x95   :  { %348 = vsyncpa [#allocation3 + $0x1], 1 }
  0x96   :  { %349 = vsyncpa [#allocation6], 1 }
  0x97   :  { %351 = vsyncpa [#allocation6 + $0x1], 1 }
  0x98   :  { %352 = vsyncpa [#allocation4], 1 }
  0x99   :  { %354 = vsyncpa [#allocation4 + $0x1], 1 }

</bundles_post_ra>
